<compile_context>
chip_gen: v6e
topology: v6e:2x2x1
jax: 0.10.0
libtpu: 0.0.40
codegen_flags: <defaults>
</compile_context>

<pallas_src>
import jax
import jax.numpy as jnp
from jax.experimental import pallas as pl
from jax.experimental.pallas import tpu as pltpu

HIDDEN_SIZE = 1
SEQ_LEN_IN = 5
SEQ_LEN_OUT = 8

# Packed-parameter layout (single (PARAM_ROWS, 1) f32 column in VMEM).
_W1_OFF = 0                                   # fc1.weight  (5 values)
_B1_OFF = _W1_OFF + SEQ_LEN_IN                # fc1.bias    (1 value)
_W2_OFF = _B1_OFF + HIDDEN_SIZE               # fcout.weight(8 values)
_B2_OFF = _W2_OFF + SEQ_LEN_OUT               # fcout.bias  (8 values)
_PARAM_LEN = _B2_OFF + SEQ_LEN_OUT            # 22
_PARAM_ROWS = ((_PARAM_LEN + 7) // 8) * 8     # 24 (sublane-aligned)

_MAX_TILE_B = 8192       # max lanes (batch elems) per grid step
_SPLIT_THRESHOLD = 1024  # below this, a single block minimizes per-step overhead


def _round_up(n, m):
    return ((n + m - 1) // m) * m


def _mlp_kernel(p_ref, x_ref, o_ref):
    # p_ref: (PARAM_ROWS, 1)        packed [w1(5), b1(1), w2(8), b2(8), pad]
    # x_ref: (SEQ_LEN_IN,  tile_b)  batch on the lane axis
    # o_ref: (SEQ_LEN_OUT, tile_b)  dense lane-full store
    p = p_ref[...]
    w1 = p[_W1_OFF:_W1_OFF + SEQ_LEN_IN, :]        # (5, 1)
    b1 = p[_B1_OFF:_B1_OFF + 1, :]                 # (1, 1)
    w2 = p[_W2_OFF:_W2_OFF + SEQ_LEN_OUT, :]       # (8, 1)
    b2 = p[_B2_OFF:_B2_OFF + SEQ_LEN_OUT, :]       # (8, 1)

    x = x_ref[...]                                              # (5, tile_b)
    h = jnp.sum(x * w1, axis=0, keepdims=True) + b1             # fc1 -> (1, tile_b)
    h = jnp.maximum(h, 0.0)                                     # ReLU
    o_ref[...] = h * w2 + b2                                    # fcout -> (8, tile_b)


def prepare_params(w1, b1, w2, b2):
    """One-time packing of PyTorch-layout Linear params into a (PARAM_ROWS, 1) column.

    w1: (HIDDEN_SIZE, SEQ_LEN_IN), b1: (HIDDEN_SIZE,)
    w2: (SEQ_LEN_OUT, HIDDEN_SIZE), b2: (SEQ_LEN_OUT,)
    """
    w1 = jnp.asarray(w1, jnp.float32).reshape(-1)   # (5,)
    b1 = jnp.asarray(b1, jnp.float32).reshape(-1)   # (1,)
    w2 = jnp.asarray(w2, jnp.float32).reshape(-1)   # (8,)  == w2[j, 0]
    b2 = jnp.asarray(b2, jnp.float32).reshape(-1)   # (8,)
    packed = jnp.concatenate([w1, b1, w2, b2])      # (22,)
    packed = jnp.pad(packed, (0, _PARAM_ROWS - _PARAM_LEN))
    return packed.reshape(_PARAM_ROWS, 1)           # (24, 1) column vector


def _tile_and_grid(batch):
    """Pick a lane-dense batch tile (multiple of 128) and grid size."""
    if batch <= _SPLIT_THRESHOLD:
        # Tiny problem: one block, one grid step (launch/DMA setup dominates).
        return _round_up(batch, 128), 1
    # Large batch: balanced, even number of steps (v7x shards the "parallel"
    # axis across its 2 TensorCores), each step capped at _MAX_TILE_B lanes.
    nsteps = max(2, _round_up(pl.cdiv(batch, _MAX_TILE_B), 2))
    tile_b = _round_up(pl.cdiv(batch, nsteps), 128)
    return tile_b, pl.cdiv(batch, tile_b)


@jax.jit
def mlp_forward(x, params_packed):
    """x: (batch, SEQ_LEN_IN, 1) float32 -> (batch, SEQ_LEN_OUT, 1) float32."""
    batch = x.shape[0]
    assert x.shape[1] == SEQ_LEN_IN
    # Layout plumbing in the wrapper: flatten (== torch flatten(start_dim=1)) and
    # put batch on the lane axis for the kernel.
    x_t = x.reshape(batch, SEQ_LEN_IN).T             # (SEQ_LEN_IN, batch)

    tile_b, grid_b = _tile_and_grid(batch)

    cost = pl.CostEstimate(
        flops=2 * batch * (SEQ_LEN_IN * HIDDEN_SIZE + HIDDEN_SIZE * SEQ_LEN_OUT),
        transcendentals=0,
        bytes_accessed=4 * (batch * (SEQ_LEN_IN + SEQ_LEN_OUT) + _PARAM_ROWS),
    )

    y_t = pl.pallas_call(
        _mlp_kernel,
        out_shape=jax.ShapeDtypeStruct((SEQ_LEN_OUT, batch), jnp.float32),
        grid=(grid_b,),
        in_specs=[
            pl.BlockSpec((_PARAM_ROWS, 1), lambda i: (0, 0)),       # packed params
            pl.BlockSpec((SEQ_LEN_IN, tile_b), lambda i: (0, i)),   # x, lane-dense
        ],
        out_specs=pl.BlockSpec((SEQ_LEN_OUT, tile_b), lambda i: (0, i)),
        compiler_params=pltpu.CompilerParams(
            dimension_semantics=("parallel",)),      # shard batch steps on v7x's 2 TCs
        cost_estimate=cost,
    )(params_packed, x_t)                            # (SEQ_LEN_OUT, batch)

    return y_t.T[..., None]                          # (batch, SEQ_LEN_OUT, 1)


def _init_params(key):
    # Deterministic init mimicking torch.nn.Linear's U(-1/sqrt(fan_in), 1/sqrt(fan_in))
    k1, k2, k3, k4 = jax.random.split(key, 4)
    lim1 = 1.0 / jnp.sqrt(SEQ_LEN_IN)
    lim2 = 1.0 / jnp.sqrt(HIDDEN_SIZE)
    w1 = jax.random.uniform(k1, (HIDDEN_SIZE, SEQ_LEN_IN), jnp.float32, -lim1, lim1)
    b1 = jax.random.uniform(k2, (HIDDEN_SIZE,), jnp.float32, -lim1, lim1)
    w2 = jax.random.uniform(k3, (SEQ_LEN_OUT, HIDDEN_SIZE), jnp.float32, -lim2, lim2)
    b2 = jax.random.uniform(k4, (SEQ_LEN_OUT,), jnp.float32, -lim2, lim2)
    return w1, b1, w2, b2


def _reference(x, w1, b1, w2, b2):
    x_flat = x.reshape(x.shape[0], -1)
    h = jnp.maximum(x_flat @ w1.T + b1, 0.0)
    return (h @ w2.T + b2)[..., None]


if __name__ == "__main__":
    key = jax.random.PRNGKey(0)
    kx, kx2, kx3, kp = jax.random.split(key, 4)
    w1, b1, w2, b2 = _init_params(kp)
    params = prepare_params(w1, b1, w2, b2)   # one-time param packing (hoisted)

    # Small batch: single partial lane block (lanes masked on writeback).
    batch = 2
    x = jax.random.normal(kx, (batch, SEQ_LEN_IN, 1), jnp.float32)
    y = mlp_forward(x, params)
    jax.block_until_ready(y)
    ref = _reference(x, w1, b1, w2, b2)
    assert y.shape == (batch, SEQ_LEN_OUT, 1)
    assert jnp.allclose(y, ref, atol=1e-5, rtol=1e-5), "mismatch vs reference (batch=2)"

    # Medium batch: single 640-lane block.
    batch2 = 600
    x2 = jax.random.normal(kx2, (batch2, SEQ_LEN_IN, 1), jnp.float32)
    y2 = mlp_forward(x2, params)
    jax.block_until_ready(y2)
    ref2 = _reference(x2, w1, b1, w2, b2)
    assert y2.shape == (batch2, SEQ_LEN_OUT, 1)
    assert jnp.allclose(y2, ref2, atol=1e-5, rtol=1e-5), "mismatch vs reference (batch=600)"

    # Large batch: balanced 2-step grid (exercises multi-step + partial edge block).
    batch3 = 2500
    x3 = jax.random.normal(kx3, (batch3, SEQ_LEN_IN, 1), jnp.float32)
    y3 = mlp_forward(x3, params)
    jax.block_until_ready(y3)
    ref3 = _reference(x3, w1, b1, w2, b2)
    assert y3.shape == (batch3, SEQ_LEN_OUT, 1)
    assert jnp.allclose(y3, ref3, atol=1e-5, rtol=1e-5), "mismatch vs reference (batch=2500)"

    print("KERNEL_OK")
</pallas_src>

<mosaic_0001>
module attributes {stable_mosaic.version = 11 : i64} {
  func.func @_mlp_kernel(%arg0: i32, %arg1: memref<24x1xf32, #tpu.memory_space<vmem>>, %arg2: memref<5x128xf32, #tpu.memory_space<vmem>>, %arg3: memref<8x128xf32, #tpu.memory_space<vmem>>) attributes {dimension_semantics = [#tpu.dimension_semantics<parallel>], iteration_bounds = array<i64: 1>, scalar_prefetch = 0 : i64, scratch_operands = 0 : i64, tpu.core_type = #tpu.core_type<tc>, window_params = [{pipeline_mode = #tpu.pipeline_mode<synchronous>, transform_indices = @transform_0, window_bounds = array<i64: 24, 1>}, {transform_indices = @transform_1, window_bounds = array<i64: 5, 128>}, {transform_indices = @transform_2, window_bounds = array<i64: 8, 128>}]} {
    %c0 = arith.constant 0 : index
    %c0_0 = arith.constant 0 : index
    %0 = vector.load %arg1[%c0, %c0_0] : memref<24x1xf32, #tpu.memory_space<vmem>>, vector<24x1xf32>
    %1 = vector.extract_strided_slice %0 {offsets = [0, 0], sizes = [5, 1], strides = [1, 1]} : vector<24x1xf32> to vector<5x1xf32>
    %2 = vector.extract_strided_slice %0 {offsets = [5, 0], sizes = [1, 1], strides = [1, 1]} : vector<24x1xf32> to vector<1x1xf32>
    %3 = vector.extract_strided_slice %0 {offsets = [6, 0], sizes = [8, 1], strides = [1, 1]} : vector<24x1xf32> to vector<8x1xf32>
    %4 = vector.extract_strided_slice %0 {offsets = [14, 0], sizes = [8, 1], strides = [1, 1]} : vector<24x1xf32> to vector<8x1xf32>
    %c0_1 = arith.constant 0 : index
    %c0_2 = arith.constant 0 : index
    %5 = vector.load %arg2[%c0_1, %c0_2] : memref<5x128xf32, #tpu.memory_space<vmem>>, vector<5x128xf32>
    %6 = vector.broadcast %1 : vector<5x1xf32> to vector<5x128xf32>
    %7 = arith.mulf %5, %6 : vector<5x128xf32>
    %cst = arith.constant dense<0.000000e+00> : vector<128xf32>
    %8 = vector.multi_reduction <add>, %7, %cst [0] : vector<5x128xf32> to vector<128xf32>
    %9 = vector.shape_cast %8 : vector<128xf32> to vector<1x128xf32>
    %10 = vector.broadcast %2 : vector<1x1xf32> to vector<1x128xf32>
    %11 = arith.addf %9, %10 : vector<1x128xf32>
    %cst_3 = arith.constant 0.000000e+00 : f32
    %12 = vector.broadcast %cst_3 : f32 to vector<1x128xf32>
    %13 = arith.maximumf %11, %12 : vector<1x128xf32>
    %14 = vector.broadcast %13 : vector<1x128xf32> to vector<8x128xf32>
    %15 = vector.broadcast %3 : vector<8x1xf32> to vector<8x128xf32>
    %16 = arith.mulf %14, %15 : vector<8x128xf32>
    %17 = vector.broadcast %4 : vector<8x1xf32> to vector<8x128xf32>
    %18 = arith.addf %16, %17 : vector<8x128xf32>
    %c0_4 = arith.constant 0 : index
    %c0_5 = arith.constant 0 : index
    %19 = vector.load %arg3[%c0_4, %c0_5] : memref<8x128xf32, #tpu.memory_space<vmem>>, vector<8x128xf32>
    tpu.vector_store %arg3[%c0_4, %c0_5], %18 {strides = array<i32>} : memref<8x128xf32, #tpu.memory_space<vmem>>, vector<8x128xf32>,
    return
  }
  func.func @transform_0(%arg0: i32) -> (i32, i32) {
    %c0_i32 = arith.constant 0 : i32
    %c0_i32_0 = arith.constant 0 : i32
    %c0_i32_1 = arith.constant 0 : i32
    return %c0_i32, %c0_i32_0 : i32, i32
  }
  func.func @transform_1(%arg0: i32) -> (i32, i32) {
    %c0_i32 = arith.constant 0 : i32
    %c0_i32_0 = arith.constant 0 : i32
    return %c0_i32, %arg0 : i32, i32
  }
  func.func @transform_2(%arg0: i32) -> (i32, i32) {
    %c0_i32 = arith.constant 0 : i32
    %c0_i32_0 = arith.constant 0 : i32
    return %c0_i32, %arg0 : i32, i32
  }
}

</mosaic_0001>

<bundles_post_ra>
// kernel: mlp_forward.1
= control target key start
LH: loop header
LB: loop body
LE: loop exit
PB: predicated region body
PF: predicated region fallthrough
CT: control target
= control target key end

     0   :  { %v58_v0 = vmov 0   ;;  %vm21_vm0 = vcmask 1044480   ;;  %v31_v11 = vlaneseq  ;;  %s92_s0 = inlined_call_operand.vmem [shape: f32[24,1], index: 0, kind: input, shape index: {}]   ;;  %s93_s1 = inlined_call_operand.vmem [shape: f32[5,2], index: 1, kind: input, shape index: {}]   ;;  %s94_s2 = inlined_call_operand.vmem [shape: f32[8,2], index: 2, kind: output, shape index: {}]  }
   0x1   :  { %56 = vset.pattern.permute.xlu0 %v58_v0  ;;  %v11_v1 = vld [vmem:[%s92_s0] sm:$0xff]  ;;  %57 = vset.pattern.permute.xlu1 %v58_v0  ;;  %v13_v2 = vld [vmem:[%s92_s0 + $0x10] sm:$0xff]  ;;  %v12_v3 = vld [vmem:[%s92_s0 + $0x8] sm:$0xff] }
   0x2   :  { %17 = vperm.xlu0 %56, %v11_v1   ;;  %44 = vperm.xlu1 %57, %v13_v2   ;;  %v14_v4 = vld [vmem:[%s93_s1] sm:$0x1f]  ;;  %v32_v14 = vshrl.u32 %v31_v11, 7 }
   0x4   :  { %v33_v17 = vsub.s32 5, %v32_v14 }
   0x6   :  { %37 = vperm.xlu0 %56, %v12_v3  }
  0x7d   :  { %v18_v5 = vpop.permute.xlu0 %17  ;;  %v45_v21 = vpop.permute.xlu1 %44 }
  0x7e   :  { %v20_v6 = vmul.f32 %v18_v5, %v14_v4 }
  0x80   :  { %v22_v7 = vsel %vm21_vm0, %v20_v6, 0.0 }
  0x81   :  { %v23_v8 = vrot.slane %v22_v7, 4  ;;  %v38_v20 = vpop.permute.xlu0 %37 }
  0x83   :  { %v24_v9 = vadd.f32 %v23_v8, %v22_v7 }
  0x85   :  { %v25_v10 = vrot.slane %v24_v9, 2 }
  0x87   :  { %v26_v12 = vadd.f32 %v25_v10, %v24_v9 }
  0x89   :  { %v27_v13 = vrot.slane %v26_v12, 1 }
  0x8b   :  { %v28_v15 = vadd.f32 %v27_v13, %v26_v12 }
  0x8d   :  { %v29_v16 = vadd.f32 %v28_v15, %v18_v5 }
  0x8f   :  { %v30_v18 = vmax.f32 %v29_v16, 0.0 }
  0x91   :  { %v34_v19 = vrot.slane %v30_v18, %v33_v17 }
  0x93   :  { %v40_v22 = vmul.f32 %v34_v19, %v18_v5  ;;  %v41_v23 = vmul.f32 %v38_v20, %v34_v19 }
  0x95   :  { %v47_v24 = vadd.f32 %v40_v22, %v38_v20  ;;  %v48_v25 = vadd.f32 %v45_v21, %v41_v23 }
  0x97   :  { %49 = vst [vmem:[%s94_s2 - $0x6] sm:$0xc0] %v47_v24  ;;  %50 = vst [vmem:[%s94_s2 + $0x2] sm:$0x3f] %v48_v25 }

</bundles_post_ra>
